<compile_context>
chip_gen: v5e
topology: v5e:2x2
jax: 0.10.0
libtpu: 0.0.40
codegen_flags: <defaults>
</compile_context>

<pallas_src>
import functools

import jax
import jax.numpy as jnp
from jax.experimental import pallas as pl
from jax.experimental.pallas import tpu as pltpu


# ----------------------------- Pallas kernel ------------------------------ #
def acm_kernel(x_ref, cw_ref, cb_ref, w3_ref, b3_ref, r_ref, s_ref, tail_ref,
               out_ref, *scratch, seq_len, clips, dot_dtype, stream_weights,
               exact_softmax):
    f32 = jnp.float32
    C = x_ref.shape[1]
    rows = clips * seq_len

    # NCT -> (rows, C): per-clip 2-D transposes (XLU) + sublane concatenation.
    # Keeps the activation transpose inside the kernel instead of an extra
    # HBM read+write in the wrapper.
    parts = [x_ref[b].T for b in range(clips)]
    h_f32 = parts[0] if clips == 1 else jnp.concatenate(parts, axis=0)

    # Per-clip boundary masks (clips are packed back-to-back along rows).
    pos = jax.lax.broadcasted_iota(jnp.int32, (rows, 1), 0) % seq_len
    first_row = pos == 0
    last_row = pos == (seq_len - 1)

    def tap_sum(u_prev, u_center, u_next):
        # y[t] = u_prev[t-1] + u_center[t] + u_next[t+1], zero-padded at clip
        # boundaries.  Shifts are XLU rolls of the matmul outputs + iota mask
        # (also prevents bleed between packed clips); no concatenate copies.
        p = jnp.where(first_row, 0.0, pltpu.roll(u_prev, shift=1, axis=0))
        n = jnp.where(last_row, 0.0, pltpu.roll(u_next, shift=rows - 1, axis=0))
        return u_center + p + n

    if stream_weights:
        # conv_1 weights live in HBM; double-buffer them per layer so the DMA
        # of layer l+1 hides under the dot of layer l (v7x / production C).
        wbuf, wsem = scratch

        def w_start(layer, slot):
            pltpu.make_async_copy(cw_ref.at[layer], wbuf.at[slot],
                                  wsem.at[slot]).start()

        def w_wait(layer, slot):
            pltpu.make_async_copy(cw_ref.at[layer], wbuf.at[slot],
                                  wsem.at[slot]).wait()

        w_start(0, 0)

    # conv_1: three (Conv1d k=3 p=1 + folded BN + ReLU) layers, ONE dot each
    # (the three tap weights are concatenated along the output dimension).
    h = h_f32.astype(dot_dtype)
    for layer in range(3):                                    # static unroll
        if stream_weights:
            slot = layer & 1
            w_wait(layer, slot)
            if layer + 1 < 3:
                w_start(layer + 1, 1 - slot)
            w_l = wbuf[slot]
        else:
            w_l = cw_ref[layer]
        u = jnp.dot(h, w_l, preferred_element_type=f32)       # (rows, 3C)
        y = tap_sum(u[:, :C], u[:, C:2 * C], u[:, 2 * C:]) + cb_ref[layer]
        h = jnp.maximum(y, 0.0).astype(dot_dtype)

    # Fused conv_2 (C->3) + fc (C->K1) head, also a single dot of width
    # 3*(K1+3); the fc columns of the +-1 taps are zero so tap_sum is exact.
    v = jnp.dot(h, w3_ref[...], preferred_element_type=f32)   # (rows, 3*w2)
    w2 = v.shape[1] // 3
    big = tap_sum(v[:, :w2], v[:, w2:2 * w2], v[:, 2 * w2:]) + b3_ref[...]

    k1 = w2 - 3
    fc_out = big[:, :k1]                                      # (rows, K1)
    logits = big[:, k1:]                                      # (rows, 3)

    # Softmax over the three attention branches.
    m = jnp.max(logits, axis=-1, keepdims=True)
    e = jnp.exp(logits - m)
    denom = jnp.sum(e, axis=-1, keepdims=True)
    if exact_softmax:
        att = e / denom
    else:
        att = e * pl.reciprocal(denom, approx=True)           # EUP slot

    # Lane-padded packed output [fc*att0 | fc*att1 | fc*att2 | att | 0-pad]:
    # the constant replication matrices do the lane broadcast on the MXU so
    # the write-back is a single dense, full-width (multiple-of-128) store.
    # NOTE: if bundle dumps ever show the MXU slot saturated, the tiny K=3
    # att @ s_mat dot can be swapped for VPU lane-masked broadcasts.
    fc_rep = jnp.dot(fc_out.astype(dot_dtype), r_ref[...],
                     preferred_element_type=f32) + tail_ref[...]
    att_rep = jnp.dot(att.astype(dot_dtype), s_ref[...],
                      preferred_element_type=f32)
    out_ref[...] = fc_rep * att_rep


# ------------------------------ sizing helpers ----------------------------- #
def _vmem_cap_bytes():
    """Per-generation VMEM cap (physical: 64 MiB on v7x, 128 MiB on v5e/v6e)."""
    try:
        kind = jax.devices()[0].device_kind.lower()
    except Exception:
        kind = ""
    return (48 << 20) if "7" in kind else (100 << 20)


def _choose_clips(B, T, per_row_bytes, fixed_bytes, vmem_cap, rows_target):
    """Pick how many clips to pack per grid step: rows = clips*T should be
    large (amortize ~0.35us/step grid overhead, fill the MXU M dim) but fit
    the VMEM budget, keep the output row tile legal (rows % 8 == 0 or the
    full array), and leave >= 2 grid steps so the 'parallel' axis can shard
    across both v7x TensorCores."""
    budget = vmem_cap - fixed_bytes
    divisors = [d for d in range(1, B + 1) if B % d == 0]
    legal = [d for d in divisors if (d * T) % 8 == 0 or d == B]
    cands = [d for d in legal if d * T * per_row_bytes <= budget]
    if not cands:
        return min(legal)   # smallest legal tile; compile reports if it OOMs
    multi = [d for d in cands if B // d >= 2] or cands
    big = [d for d in multi if d * T >= rows_target]
    return min(big) if big else max(multi)


# ------------------------------- wrapper ---------------------------------- #
def acmnet_forward(x_nct, params, *, compute_dtype=jnp.bfloat16,
                   stream_conv_weights=None, clips_per_step=None,
                   rows_target=512, exact_softmax=False):
    """x_nct: (B, len_feature, T) exactly as the PyTorch module takes it.
    Returns (instance, context, background, attention):
    (B,T,K+1) x3 and (B,T,3)."""
    x = x_nct.astype(jnp.float32)              # stays NCT; no wrapper transpose
    B, C, T = x.shape
    fc_w, fc_b = params["fc_w"], params["fc_b"]
    c2w, c2b = params["conv2_w"], params["conv2_b"]
    K1 = fc_w.shape[1]
    w2 = K1 + 3                                # fused fc + conv_2 width per tap
    w_out = 3 * K1 + 3                         # useful packed output width
    w_pad = ((w_out + 127) // 128) * 128       # lane-dense store width
    itemsize = jnp.dtype(compute_dtype).itemsize

    # ---- weight packing (free JAX-side plumbing) --------------------------
    # conv_1: (layer, tap, Cin, Cout) -> (layer, Cin, 3*Cout); taps along N so
    # each layer is a single MXU dot.
    cw_raw = params["conv_w"]
    cw = jnp.concatenate([cw_raw[:, 0], cw_raw[:, 1], cw_raw[:, 2]],
                         axis=-1).astype(compute_dtype)        # (3, C, 3C)
    cb = params["conv_b"]                                      # (3, 1, C) f32

    # Fused fc + conv_2 head, taps along N as well -> (C, 3*w2).
    zeros_ck = jnp.zeros((C, K1), jnp.float32)
    w3 = jnp.concatenate([
        jnp.concatenate([zeros_ck, c2w[0]], axis=1),           # tap t-1
        jnp.concatenate([fc_w,     c2w[1]], axis=1),           # tap t
        jnp.concatenate([zeros_ck, c2w[2]], axis=1),           # tap t+1
    ], axis=1).astype(compute_dtype)                           # (C, 3*w2)
    b3 = jnp.concatenate([fc_b, c2b], axis=1)                  # (1, w2) f32

    # Output-packing matrices, zero-padded to w_pad lanes:
    #   out = (fc @ R + tail) * (att @ S); pad columns come out exactly 0.
    eye = jnp.eye(K1, dtype=jnp.float32)
    r_mat = jnp.zeros((K1, w_pad), jnp.float32)
    s_mat = jnp.zeros((3, w_pad), jnp.float32)
    for j in range(3):
        r_mat = r_mat.at[:, j * K1:(j + 1) * K1].set(eye)
        s_mat = s_mat.at[j, j * K1:(j + 1) * K1].set(1.0)
        s_mat = s_mat.at[j, 3 * K1 + j].set(1.0)
    tail = jnp.zeros((1, w_pad), jnp.float32).at[:, 3 * K1:3 * K1 + 3].set(1.0)
    r_mat = r_mat.astype(compute_dtype)
    s_mat = s_mat.astype(compute_dtype)

    # ---- per-generation buffer sizing --------------------------------------
    vmem_cap = _vmem_cap_bytes()
    cw_bytes = 3 * C * 3 * C * itemsize
    if stream_conv_weights is None:
        # Resident constant blocks are double-buffered by the pipeline; stream
        # from HBM when that resident copy would eat a big slice of VMEM
        # (always true at production len_feature, mandatory on v7x).
        stream_conv_weights = 2 * cw_bytes > vmem_cap // 3
    small_const_bytes = ((cb.size + b3.size + tail.size) * 4
                         + (w3.size + r_mat.size + s_mat.size) * itemsize)
    fixed_bytes = 2 * small_const_bytes
    if stream_conv_weights:
        fixed_bytes += 2 * (C * 3 * C * itemsize)              # wbuf scratch
    else:
        fixed_bytes += 2 * cw_bytes
    per_row_bytes = (4 * (2 * C)                               # x block, 2 bufs
                     + 4 * (2 * w_pad)                         # out block, 2 bufs
                     + 4 * (4 * C + 3 * w2 + 2 * w_pad)        # f32 temporaries
                     + itemsize * C)                           # bf16 activations

    bt = (clips_per_step if clips_per_step is not None else
          _choose_clips(B, T, per_row_bytes, fixed_bytes, vmem_cap, rows_target))
    assert B % bt == 0 and (bt * T % 8 == 0 or bt == B), (B, T, bt)
    rows = bt * T
    vmem_limit = int(min(vmem_cap,
                         max(32 << 20,
                             2 * (fixed_bytes + rows * per_row_bytes))))

    kernel = functools.partial(
        acm_kernel, seq_len=T, clips=bt, dot_dtype=compute_dtype,
        stream_weights=stream_conv_weights, exact_softmax=exact_softmax)

    def const_spec(shape):
        return pl.BlockSpec(shape, lambda i: (0,) * len(shape))

    if stream_conv_weights:
        cw_spec = pl.BlockSpec(memory_space=pl.ANY)            # stays in HBM
        scratch = [pltpu.VMEM((2, C, 3 * C), compute_dtype),
                   pltpu.SemaphoreType.DMA((2,))]
    else:
        cw_spec = const_spec((3, C, 3 * C))
        scratch = []

    packed = pl.pallas_call(
        kernel,
        out_shape=jax.ShapeDtypeStruct((B * T, w_pad), jnp.float32),
        grid_spec=pltpu.PrefetchScalarGridSpec(
            num_scalar_prefetch=0,
            grid=(B // bt,),
            in_specs=[
                pl.BlockSpec((bt, C, T), lambda i: (i, 0, 0)),  # NCT clips
                cw_spec,                                        # conv_1 W (BN folded)
                const_spec((3, 1, C)),                          # conv_1 b (BN folded)
                const_spec((C, 3 * w2)),                        # fused head W
                const_spec((1, w2)),                            # fused head b
                const_spec((K1, w_pad)),                        # fc replication
                const_spec((3, w_pad)),                         # att replication
                const_spec((1, w_pad)),                         # tail ones
            ],
            out_specs=pl.BlockSpec((rows, w_pad), lambda i: (i, 0)),
            scratch_shapes=scratch,
        ),
        compiler_params=pltpu.CompilerParams(
            dimension_semantics=("parallel",),
            vmem_limit_bytes=vmem_limit,
        ),
    )(x, cw, cb, w3, b3, r_mat, s_mat, tail)

    packed = packed.reshape(B, T, w_pad)
    instance = packed[..., 0:K1]
    context = packed[..., K1:2 * K1]
    background = packed[..., 2 * K1:3 * K1]
    attention = packed[..., 3 * K1:3 * K1 + 3]
    return instance, context, background, attention


# ----------------------- deterministic parameter init --------------------- #
def make_params(key, len_feature, num_classes):
    C, K1 = len_feature, num_classes + 1
    ks = jax.random.split(key, 10)
    # conv_1 weights stacked as (layer, tap, Cin, Cout); tap 0 -> x[t-1]
    conv_w = 0.05 * jax.random.normal(ks[0], (3, 3, C, C), jnp.float32)
    conv_b = 0.05 * jax.random.normal(ks[1], (3, 1, C), jnp.float32)
    # BatchNorm1d (eval mode, running stats) parameters per layer
    bn_gamma = 1.0 + 0.1 * jax.random.normal(ks[2], (3, 1, C), jnp.float32)
    bn_beta = 0.05 * jax.random.normal(ks[3], (3, 1, C), jnp.float32)
    bn_mean = 0.05 * jax.random.normal(ks[4], (3, 1, C), jnp.float32)
    bn_var = 1.0 + 0.1 * jnp.abs(jax.random.normal(ks[5], (3, 1, C), jnp.float32))
    eps = 1e-5
    scale = bn_gamma / jnp.sqrt(bn_var + eps)                   # per out channel
    shift = bn_beta - bn_mean * scale
    # Fold BN into conv:  BN(conv(x)+b) = conv(x)*scale + (b*scale + shift)
    w_eff = conv_w * scale[:, None, :, :]
    b_eff = conv_b * scale + shift
    conv2_w = 0.05 * jax.random.normal(ks[6], (3, C, 3), jnp.float32)
    conv2_b = 0.05 * jax.random.normal(ks[7], (1, 3), jnp.float32)
    fc_w = 0.05 * jax.random.normal(ks[8], (C, K1), jnp.float32)
    fc_b = 0.05 * jax.random.normal(ks[9], (1, K1), jnp.float32)
    return dict(conv_w=w_eff, conv_b=b_eff, conv2_w=conv2_w,
                conv2_b=conv2_b, fc_w=fc_w, fc_b=fc_b)


# ------------------------------ JAX reference ------------------------------ #
def ref_forward(x_nct, params):
    x = jnp.transpose(x_nct, (0, 2, 1)).astype(jnp.float32)     # (B, T, C)

    def conv_k3(h, w, b):
        zp = jnp.zeros_like(h[:, :1, :])
        prev = jnp.concatenate([zp, h[:, :-1, :]], axis=1)
        nxt = jnp.concatenate([h[:, 1:, :], zp], axis=1)
        return prev @ w[0] + h @ w[1] + nxt @ w[2] + b

    h = x
    for l in range(3):
        h = jax.nn.relu(conv_k3(h, params["conv_w"][l], params["conv_b"][l]))
    att = jax.nn.softmax(conv_k3(h, params["conv2_w"], params["conv2_b"]), axis=-1)
    fc = h @ params["fc_w"] + params["fc_b"]
    return fc * att[..., 0:1], fc * att[..., 1:2], fc * att[..., 2:3], att


if __name__ == "__main__":
    B, len_feature, T, num_classes = 2, 32, 16, 7
    key = jax.random.PRNGKey(0)
    kx, kp = jax.random.split(key)
    x = jax.random.normal(kx, (B, len_feature, T), jnp.float32)  # PyTorch NCT
    params = make_params(kp, len_feature, num_classes)

    refs = ref_forward(x, params)
    names = ("instance", "context", "background", "attention")

    def check(outs, atol, rtol, tag):
        for name, o, r in zip(names, outs, refs):
            assert o.shape == r.shape, (tag, name, o.shape, r.shape)
            assert bool(jnp.allclose(o, r, atol=atol, rtol=rtol)), (tag, name)

    # 1) exact f32 path, two clips packed per grid step: tightly verifies the
    #    packed clip-boundary masking and the exact-softmax branch.
    outs = jax.block_until_ready(acmnet_forward(
        x, params, compute_dtype=jnp.float32, clips_per_step=2,
        exact_softmax=True))
    check(outs, 2e-3, 2e-3, "f32")

    # 2) default path: bf16 MXU operands, auto row tiling (grid of 2 steps so
    #    both v7x TensorCores would be used).  Looser tolerance for bf16.
    outs = jax.block_until_ready(acmnet_forward(x, params))
    check(outs, 5e-2, 5e-2, "bf16")

    # 3) v7x / production-channel path: conv_1 weights streamed from HBM per
    #    layer through a double-buffered VMEM scratch.
    outs = jax.block_until_ready(acmnet_forward(
        x, params, stream_conv_weights=True))
    check(outs, 5e-2, 5e-2, "bf16-streamed")

    # TODO(synk): BatchNorm1d training-mode (batch statistics) is not
    # implemented; eval-mode running stats are folded into the conv weights.
    print("KERNEL_OK")
</pallas_src>

<mosaic_0001>
module attributes {stable_mosaic.version = 11 : i64} {
  func.func @acm_kernel(%arg0: i32, %arg1: memref<2x32x16xf32, #tpu.memory_space<vmem>>, %arg2: memref<3x32x96xf32, #tpu.memory_space<vmem>>, %arg3: memref<3x1x32xf32, #tpu.memory_space<vmem>>, %arg4: memref<32x33xf32, #tpu.memory_space<vmem>>, %arg5: memref<1x11xf32, #tpu.memory_space<vmem>>, %arg6: memref<8x128xf32, #tpu.memory_space<vmem>>, %arg7: memref<3x128xf32, #tpu.memory_space<vmem>>, %arg8: memref<1x128xf32, #tpu.memory_space<vmem>>, %arg9: memref<32x128xf32, #tpu.memory_space<vmem>>) attributes {dimension_semantics = [#tpu.dimension_semantics<parallel>], iteration_bounds = array<i64: 1>, scalar_prefetch = 0 : i64, scratch_operands = 0 : i64, tpu.core_type = #tpu.core_type<tc>, window_params = [{transform_indices = @transform_0, window_bounds = array<i64: 2, 32, 16>}, {pipeline_mode = #tpu.pipeline_mode<synchronous>, transform_indices = @transform_1, window_bounds = array<i64: 3, 32, 96>}, {pipeline_mode = #tpu.pipeline_mode<synchronous>, transform_indices = @transform_2, window_bounds = array<i64: 3, 1, 32>}, {pipeline_mode = #tpu.pipeline_mode<synchronous>, transform_indices = @transform_3, window_bounds = array<i64: 32, 33>}, {pipeline_mode = #tpu.pipeline_mode<synchronous>, transform_indices = @transform_4, window_bounds = array<i64: 1, 11>}, {pipeline_mode = #tpu.pipeline_mode<synchronous>, transform_indices = @transform_5, window_bounds = array<i64: 8, 128>}, {pipeline_mode = #tpu.pipeline_mode<synchronous>, transform_indices = @transform_6, window_bounds = array<i64: 3, 128>}, {pipeline_mode = #tpu.pipeline_mode<synchronous>, transform_indices = @transform_7, window_bounds = array<i64: 1, 128>}, {transform_indices = @transform_8, window_bounds = array<i64: 32, 128>}]} {
    %c0 = arith.constant 0 : index
    %c0_0 = arith.constant 0 : index
    %c0_1 = arith.constant 0 : index
    %0 = vector.load %arg1[%c0, %c0_0, %c0_1] : memref<2x32x16xf32, #tpu.memory_space<vmem>>, vector<1x32x16xf32>
    %1 = vector.shape_cast %0 : vector<1x32x16xf32> to vector<32x16xf32>
    %2 = tpu.transpose %1, [1, 0] : vector<32x16xf32> -> vector<16x32xf32>
    %c1 = arith.constant 1 : index
    %c0_2 = arith.constant 0 : index
    %c0_3 = arith.constant 0 : index
    %3 = vector.load %arg1[%c1, %c0_2, %c0_3] : memref<2x32x16xf32, #tpu.memory_space<vmem>>, vector<1x32x16xf32>
    %4 = vector.shape_cast %3 : vector<1x32x16xf32> to vector<32x16xf32>
    %5 = tpu.transpose %4, [1, 0] : vector<32x16xf32> -> vector<16x32xf32>
    %6 = tpu.concatenate %2, %5 in 0 : vector<16x32xf32>, vector<16x32xf32> -> vector<32x32xf32>
    %7 = tpu.iota {dimensions = array<i32: 0>} : vector<32x1xi32>
    %c16_i32 = arith.constant 16 : i32
    %c0_i32 = arith.constant 0 : i32
    %8 = arith.cmpi eq, %c16_i32, %c0_i32 : i32
    %c1_i32 = arith.constant 1 : i32
    %9 = arith.select %8, %c1_i32, %c16_i32 : i32
    %10 = vector.broadcast %9 : i32 to vector<32x1xi32>
    %11 = arith.remsi %7, %10 : vector<32x1xi32>
    %c0_i32_4 = arith.constant 0 : i32
    %12 = vector.broadcast %c0_i32_4 : i32 to vector<32x1xi32>
    %13 = arith.cmpi ne, %11, %12 : vector<32x1xi32>
    %c0_i32_5 = arith.constant 0 : i32
    %14 = vector.broadcast %c0_i32_5 : i32 to vector<32x1xi32>
    %15 = arith.cmpi slt, %11, %14 : vector<32x1xi32>
    %c0_i32_6 = arith.constant 0 : i32
    %16 = arith.cmpi slt, %9, %c0_i32_6 : i32
    %17 = vector.broadcast %16 : i1 to vector<32x1xi1>
    %18 = vector.broadcast %17 : vector<32x1xi1> to vector<32x1xi1>
    %19 = arith.xori %15, %18 : vector<32x1xi1>
    %20 = arith.andi %19, %13 : vector<32x1xi1>
    %21 = vector.broadcast %9 : i32 to vector<32x1xi32>
    %22 = arith.addi %11, %21 : vector<32x1xi32>
    %23 = arith.select %20, %22, %11 : vector<32x1xi1>, vector<32x1xi32>
    %c0_i32_7 = arith.constant 0 : i32
    %24 = vector.broadcast %c0_i32_7 : i32 to vector<32x1xi32>
    %25 = arith.cmpi eq, %23, %24 : vector<32x1xi32>
    %c15_i32 = arith.constant 15 : i32
    %26 = vector.broadcast %c15_i32 : i32 to vector<32x1xi32>
    %27 = arith.cmpi eq, %23, %26 : vector<32x1xi32>
    %c0_8 = arith.constant 0 : index
    %c0_9 = arith.constant 0 : index
    %c0_10 = arith.constant 0 : index
    %28 = vector.load %arg2[%c0_8, %c0_9, %c0_10] : memref<3x32x96xf32, #tpu.memory_space<vmem>>, vector<1x32x96xf32>
    %29 = vector.shape_cast %28 : vector<1x32x96xf32> to vector<32x96xf32>
    %cst = arith.constant dense<0.000000e+00> : vector<32x96xf32>
    %30 = tpu.matmul %6, %29, %cst {dimension_numbers = #tpu.dot_dimension_numbers<[1], [0], [0], [1], [0, 0, 1, 1], [], []>} : vector<32x32xf32>, vector<32x96xf32>, vector<32x96xf32> -> vector<32x96xf32>
    %31 = vector.extract_strided_slice %30 {offsets = [0, 0], sizes = [32, 32], strides = [1, 1]} : vector<32x96xf32> to vector<32x32xf32>
    %32 = vector.extract_strided_slice %30 {offsets = [0, 32], sizes = [32, 32], strides = [1, 1]} : vector<32x96xf32> to vector<32x32xf32>
    %33 = vector.extract_strided_slice %30 {offsets = [0, 64], sizes = [32, 32], strides = [1, 1]} : vector<32x96xf32> to vector<32x32xf32>
    %c1_i32_11 = arith.constant 1 : i32
    %34 = tpu.dynamic_rotate %31 by %c1_i32_11 dim 0 : vector<32x32xf32>, i32 -> vector<32x32xf32>
    %cst_12 = arith.constant 0.000000e+00 : f32
    %35 = vector.shape_cast %25 : vector<32x1xi1> to vector<32x1xi1>
    %36 = vector.broadcast %35 : vector<32x1xi1> to vector<32x32xi1>
    %37 = vector.broadcast %cst_12 : f32 to vector<32x32xf32>
    %38 = arith.select %36, %37, %34 : vector<32x32xi1>, vector<32x32xf32>
    %c31_i32 = arith.constant 31 : i32
    %39 = tpu.dynamic_rotate %33 by %c31_i32 dim 0 : vector<32x32xf32>, i32 -> vector<32x32xf32>
    %cst_13 = arith.constant 0.000000e+00 : f32
    %40 = vector.shape_cast %27 : vector<32x1xi1> to vector<32x1xi1>
    %41 = vector.broadcast %40 : vector<32x1xi1> to vector<32x32xi1>
    %42 = vector.broadcast %cst_13 : f32 to vector<32x32xf32>
    %43 = arith.select %41, %42, %39 : vector<32x32xi1>, vector<32x32xf32>
    %44 = arith.addf %32, %38 : vector<32x32xf32>
    %45 = arith.addf %44, %43 : vector<32x32xf32>
    %c0_14 = arith.constant 0 : index
    %c0_15 = arith.constant 0 : index
    %c0_16 = arith.constant 0 : index
    %46 = vector.load %arg3[%c0_14, %c0_15, %c0_16] : memref<3x1x32xf32, #tpu.memory_space<vmem>>, vector<1x1x32xf32>
    %47 = vector.shape_cast %46 : vector<1x1x32xf32> to vector<1x32xf32>
    %48 = vector.broadcast %47 : vector<1x32xf32> to vector<32x32xf32>
    %49 = arith.addf %45, %48 : vector<32x32xf32>
    %cst_17 = arith.constant 0.000000e+00 : f32
    %50 = vector.broadcast %cst_17 : f32 to vector<32x32xf32>
    %51 = arith.maximumf %49, %50 : vector<32x32xf32>
    %c1_18 = arith.constant 1 : index
    %c0_19 = arith.constant 0 : index
    %c0_20 = arith.constant 0 : index
    %52 = vector.load %arg2[%c1_18, %c0_19, %c0_20] : memref<3x32x96xf32, #tpu.memory_space<vmem>>, vector<1x32x96xf32>
    %53 = vector.shape_cast %52 : vector<1x32x96xf32> to vector<32x96xf32>
    %cst_21 = arith.constant dense<0.000000e+00> : vector<32x96xf32>
    %54 = tpu.matmul %51, %53, %cst_21 {dimension_numbers = #tpu.dot_dimension_numbers<[1], [0], [0], [1], [0, 0, 1, 1], [], []>} : vector<32x32xf32>, vector<32x96xf32>, vector<32x96xf32> -> vector<32x96xf32>
    %55 = vector.extract_strided_slice %54 {offsets = [0, 0], sizes = [32, 32], strides = [1, 1]} : vector<32x96xf32> to vector<32x32xf32>
    %56 = vector.extract_strided_slice %54 {offsets = [0, 32], sizes = [32, 32], strides = [1, 1]} : vector<32x96xf32> to vector<32x32xf32>
    %57 = vector.extract_strided_slice %54 {offsets = [0, 64], sizes = [32, 32], strides = [1, 1]} : vector<32x96xf32> to vector<32x32xf32>
    %c1_i32_22 = arith.constant 1 : i32
    %58 = tpu.dynamic_rotate %55 by %c1_i32_22 dim 0 : vector<32x32xf32>, i32 -> vector<32x32xf32>
    %cst_23 = arith.constant 0.000000e+00 : f32
    %59 = vector.shape_cast %25 : vector<32x1xi1> to vector<32x1xi1>
    %60 = vector.broadcast %59 : vector<32x1xi1> to vector<32x32xi1>
    %61 = vector.broadcast %cst_23 : f32 to vector<32x32xf32>
    %62 = arith.select %60, %61, %58 : vector<32x32xi1>, vector<32x32xf32>
    %c31_i32_24 = arith.constant 31 : i32
    %63 = tpu.dynamic_rotate %57 by %c31_i32_24 dim 0 : vector<32x32xf32>, i32 -> vector<32x32xf32>
    %cst_25 = arith.constant 0.000000e+00 : f32
    %64 = vector.shape_cast %27 : vector<32x1xi1> to vector<32x1xi1>
    %65 = vector.broadcast %64 : vector<32x1xi1> to vector<32x32xi1>
    %66 = vector.broadcast %cst_25 : f32 to vector<32x32xf32>
    %67 = arith.select %65, %66, %63 : vector<32x32xi1>, vector<32x32xf32>
    %68 = arith.addf %56, %62 : vector<32x32xf32>
    %69 = arith.addf %68, %67 : vector<32x32xf32>
    %c1_26 = arith.constant 1 : index
    %c0_27 = arith.constant 0 : index
    %c0_28 = arith.constant 0 : index
    %70 = vector.load %arg3[%c1_26, %c0_27, %c0_28] : memref<3x1x32xf32, #tpu.memory_space<vmem>>, vector<1x1x32xf32>
    %71 = vector.shape_cast %70 : vector<1x1x32xf32> to vector<1x32xf32>
    %72 = vector.broadcast %71 : vector<1x32xf32> to vector<32x32xf32>
    %73 = arith.addf %69, %72 : vector<32x32xf32>
    %cst_29 = arith.constant 0.000000e+00 : f32
    %74 = vector.broadcast %cst_29 : f32 to vector<32x32xf32>
    %75 = arith.maximumf %73, %74 : vector<32x32xf32>
    %c2 = arith.constant 2 : index
    %c0_30 = arith.constant 0 : index
    %c0_31 = arith.constant 0 : index
    %76 = vector.load %arg2[%c2, %c0_30, %c0_31] : memref<3x32x96xf32, #tpu.memory_space<vmem>>, vector<1x32x96xf32>
    %77 = vector.shape_cast %76 : vector<1x32x96xf32> to vector<32x96xf32>
    %cst_32 = arith.constant dense<0.000000e+00> : vector<32x96xf32>
    %78 = tpu.matmul %75, %77, %cst_32 {dimension_numbers = #tpu.dot_dimension_numbers<[1], [0], [0], [1], [0, 0, 1, 1], [], []>} : vector<32x32xf32>, vector<32x96xf32>, vector<32x96xf32> -> vector<32x96xf32>
    %79 = vector.extract_strided_slice %78 {offsets = [0, 0], sizes = [32, 32], strides = [1, 1]} : vector<32x96xf32> to vector<32x32xf32>
    %80 = vector.extract_strided_slice %78 {offsets = [0, 32], sizes = [32, 32], strides = [1, 1]} : vector<32x96xf32> to vector<32x32xf32>
    %81 = vector.extract_strided_slice %78 {offsets = [0, 64], sizes = [32, 32], strides = [1, 1]} : vector<32x96xf32> to vector<32x32xf32>
    %c1_i32_33 = arith.constant 1 : i32
    %82 = tpu.dynamic_rotate %79 by %c1_i32_33 dim 0 : vector<32x32xf32>, i32 -> vector<32x32xf32>
    %cst_34 = arith.constant 0.000000e+00 : f32
    %83 = vector.shape_cast %25 : vector<32x1xi1> to vector<32x1xi1>
    %84 = vector.broadcast %83 : vector<32x1xi1> to vector<32x32xi1>
    %85 = vector.broadcast %cst_34 : f32 to vector<32x32xf32>
    %86 = arith.select %84, %85, %82 : vector<32x32xi1>, vector<32x32xf32>
    %c31_i32_35 = arith.constant 31 : i32
    %87 = tpu.dynamic_rotate %81 by %c31_i32_35 dim 0 : vector<32x32xf32>, i32 -> vector<32x32xf32>
    %cst_36 = arith.constant 0.000000e+00 : f32
    %88 = vector.shape_cast %27 : vector<32x1xi1> to vector<32x1xi1>
    %89 = vector.broadcast %88 : vector<32x1xi1> to vector<32x32xi1>
    %90 = vector.broadcast %cst_36 : f32 to vector<32x32xf32>
    %91 = arith.select %89, %90, %87 : vector<32x32xi1>, vector<32x32xf32>
    %92 = arith.addf %80, %86 : vector<32x32xf32>
    %93 = arith.addf %92, %91 : vector<32x32xf32>
    %c2_37 = arith.constant 2 : index
    %c0_38 = arith.constant 0 : index
    %c0_39 = arith.constant 0 : index
    %94 = vector.load %arg3[%c2_37, %c0_38, %c0_39] : memref<3x1x32xf32, #tpu.memory_space<vmem>>, vector<1x1x32xf32>
    %95 = vector.shape_cast %94 : vector<1x1x32xf32> to vector<1x32xf32>
    %96 = vector.broadcast %95 : vector<1x32xf32> to vector<32x32xf32>
    %97 = arith.addf %93, %96 : vector<32x32xf32>
    %cst_40 = arith.constant 0.000000e+00 : f32
    %98 = vector.broadcast %cst_40 : f32 to vector<32x32xf32>
    %99 = arith.maximumf %97, %98 : vector<32x32xf32>
    %c0_41 = arith.constant 0 : index
    %c0_42 = arith.constant 0 : index
    %100 = vector.load %arg4[%c0_41, %c0_42] : memref<32x33xf32, #tpu.memory_space<vmem>>, vector<32x33xf32>
    %cst_43 = arith.constant dense<0.000000e+00> : vector<32x33xf32>
    %101 = tpu.matmul %99, %100, %cst_43 {dimension_numbers = #tpu.dot_dimension_numbers<[1], [0], [0], [1], [0, 0, 1, 1], [], []>} : vector<32x32xf32>, vector<32x33xf32>, vector<32x33xf32> -> vector<32x33xf32>
    %102 = vector.extract_strided_slice %101 {offsets = [0, 0], sizes = [32, 11], strides = [1, 1]} : vector<32x33xf32> to vector<32x11xf32>
    %103 = vector.extract_strided_slice %101 {offsets = [0, 11], sizes = [32, 11], strides = [1, 1]} : vector<32x33xf32> to vector<32x11xf32>
    %104 = vector.extract_strided_slice %101 {offsets = [0, 22], sizes = [32, 11], strides = [1, 1]} : vector<32x33xf32> to vector<32x11xf32>
    %c1_i32_44 = arith.constant 1 : i32
    %105 = tpu.dynamic_rotate %102 by %c1_i32_44 dim 0 : vector<32x11xf32>, i32 -> vector<32x11xf32>
    %cst_45 = arith.constant 0.000000e+00 : f32
    %106 = vector.shape_cast %25 : vector<32x1xi1> to vector<32x1xi1>
    %107 = vector.broadcast %106 : vector<32x1xi1> to vector<32x11xi1>
    %108 = vector.broadcast %cst_45 : f32 to vector<32x11xf32>
    %109 = arith.select %107, %108, %105 : vector<32x11xi1>, vector<32x11xf32>
    %c31_i32_46 = arith.constant 31 : i32
    %110 = tpu.dynamic_rotate %104 by %c31_i32_46 dim 0 : vector<32x11xf32>, i32 -> vector<32x11xf32>
    %cst_47 = arith.constant 0.000000e+00 : f32
    %111 = vector.shape_cast %27 : vector<32x1xi1> to vector<32x1xi1>
    %112 = vector.broadcast %111 : vector<32x1xi1> to vector<32x11xi1>
    %113 = vector.broadcast %cst_47 : f32 to vector<32x11xf32>
    %114 = arith.select %112, %113, %110 : vector<32x11xi1>, vector<32x11xf32>
    %115 = arith.addf %103, %109 : vector<32x11xf32>
    %116 = arith.addf %115, %114 : vector<32x11xf32>
    %c0_48 = arith.constant 0 : index
    %c0_49 = arith.constant 0 : index
    %117 = vector.load %arg5[%c0_48, %c0_49] : memref<1x11xf32, #tpu.memory_space<vmem>>, vector<1x11xf32>
    %118 = vector.broadcast %117 : vector<1x11xf32> to vector<32x11xf32>
    %119 = arith.addf %116, %118 : vector<32x11xf32>
    %120 = vector.extract_strided_slice %119 {offsets = [0, 0], sizes = [32, 8], strides = [1, 1]} : vector<32x11xf32> to vector<32x8xf32>
    %121 = vector.extract_strided_slice %119 {offsets = [0, 8], sizes = [32, 3], strides = [1, 1]} : vector<32x11xf32> to vector<32x3xf32>
    %cst_50 = arith.constant dense<0xFF800000> : vector<32xf32>
    %122 = vector.multi_reduction <maximumf>, %121, %cst_50 [1] : vector<32x3xf32> to vector<32xf32>
    %123 = vector.shape_cast %122 : vector<32xf32> to vector<32x1xf32>
    %124 = vector.broadcast %123 : vector<32x1xf32> to vector<32x3xf32>
    %125 = arith.subf %121, %124 : vector<32x3xf32>
    %126 = math.exp %125 : vector<32x3xf32>
    %cst_51 = arith.constant dense<0.000000e+00> : vector<32xf32>
    %127 = vector.multi_reduction <add>, %126, %cst_51 [1] : vector<32x3xf32> to vector<32xf32>
    %128 = vector.shape_cast %127 : vector<32xf32> to vector<32x1xf32>
    %129 = vector.broadcast %128 : vector<32x1xf32> to vector<32x3xf32>
    %130 = arith.divf %126, %129 : vector<32x3xf32>
    %c0_52 = arith.constant 0 : index
    %c0_53 = arith.constant 0 : index
    %131 = vector.load %arg6[%c0_52, %c0_53] : memref<8x128xf32, #tpu.memory_space<vmem>>, vector<8x128xf32>
    %cst_54 = arith.constant dense<0.000000e+00> : vector<32x128xf32>
    %132 = tpu.matmul %120, %131, %cst_54 {dimension_numbers = #tpu.dot_dimension_numbers<[1], [0], [0], [1], [0, 0, 1, 1], [], []>} : vector<32x8xf32>, vector<8x128xf32>, vector<32x128xf32> -> vector<32x128xf32>
    %c0_55 = arith.constant 0 : index
    %c0_56 = arith.constant 0 : index
    %133 = vector.load %arg8[%c0_55, %c0_56] : memref<1x128xf32, #tpu.memory_space<vmem>>, vector<1x128xf32>
    %134 = vector.broadcast %133 : vector<1x128xf32> to vector<32x128xf32>
    %135 = arith.addf %132, %134 : vector<32x128xf32>
    %c0_57 = arith.constant 0 : index
    %c0_58 = arith.constant 0 : index
    %136 = vector.load %arg7[%c0_57, %c0_58] : memref<3x128xf32, #tpu.memory_space<vmem>>, vector<3x128xf32>
    %cst_59 = arith.constant dense<0.000000e+00> : vector<32x128xf32>
    %137 = tpu.matmul %130, %136, %cst_59 {dimension_numbers = #tpu.dot_dimension_numbers<[1], [0], [0], [1], [0, 0, 1, 1], [], []>} : vector<32x3xf32>, vector<3x128xf32>, vector<32x128xf32> -> vector<32x128xf32>
    %138 = arith.mulf %135, %137 : vector<32x128xf32>
    %c0_60 = arith.constant 0 : index
    %c0_61 = arith.constant 0 : index
    %139 = vector.load %arg9[%c0_60, %c0_61] : memref<32x128xf32, #tpu.memory_space<vmem>>, vector<32x128xf32>
    tpu.vector_store %arg9[%c0_60, %c0_61], %138 {strides = array<i32>} : memref<32x128xf32, #tpu.memory_space<vmem>>, vector<32x128xf32>,
    return
  }
  func.func @transform_0(%arg0: i32) -> (i32, i32, i32) {
    %c0_i32 = arith.constant 0 : i32
    %c0_i32_0 = arith.constant 0 : i32
    %c0_i32_1 = arith.constant 0 : i32
    return %arg0, %c0_i32, %c0_i32_0 : i32, i32, i32
  }
  func.func @transform_1(%arg0: i32) -> (i32, i32, i32) {
    %c0_i32 = arith.constant 0 : i32
    %c0_i32_0 = arith.constant 0 : i32
    %c0_i32_1 = arith.constant 0 : i32
    %c0_i32_2 = arith.constant 0 : i32
    return %c0_i32, %c0_i32_0, %c0_i32_1 : i32, i32, i32
  }
  func.func @transform_2(%arg0: i32) -> (i32, i32, i32) {
    %c0_i32 = arith.constant 0 : i32
    %c0_i32_0 = arith.constant 0 : i32
    %c0_i32_1 = arith.constant 0 : i32
    %c0_i32_2 = arith.constant 0 : i32
    return %c0_i32, %c0_i32_0, %c0_i32_1 : i32, i32, i32
  }
  func.func @transform_3(%arg0: i32) -> (i32, i32) {
    %c0_i32 = arith.constant 0 : i32
    %c0_i32_0 = arith.constant 0 : i32
    %c0_i32_1 = arith.constant 0 : i32
    return %c0_i32, %c0_i32_0 : i32, i32
  }
  func.func @transform_4(%arg0: i32) -> (i32, i32) {
    %c0_i32 = arith.constant 0 : i32
    %c0_i32_0 = arith.constant 0 : i32
    %c0_i32_1 = arith.constant 0 : i32
    return %c0_i32, %c0_i32_0 : i32, i32
  }
  func.func @transform_5(%arg0: i32) -> (i32, i32) {
    %c0_i32 = arith.constant 0 : i32
    %c0_i32_0 = arith.constant 0 : i32
    %c0_i32_1 = arith.constant 0 : i32
    return %c0_i32, %c0_i32_0 : i32, i32
  }
  func.func @transform_6(%arg0: i32) -> (i32, i32) {
    %c0_i32 = arith.constant 0 : i32
    %c0_i32_0 = arith.constant 0 : i32
    %c0_i32_1 = arith.constant 0 : i32
    return %c0_i32, %c0_i32_0 : i32, i32
  }
  func.func @transform_7(%arg0: i32) -> (i32, i32) {
    %c0_i32 = arith.constant 0 : i32
    %c0_i32_0 = arith.constant 0 : i32
    %c0_i32_1 = arith.constant 0 : i32
    return %c0_i32, %c0_i32_0 : i32, i32
  }
  func.func @transform_8(%arg0: i32) -> (i32, i32) {
    %c0_i32 = arith.constant 0 : i32
    %c0_i32_0 = arith.constant 0 : i32
    return %arg0, %c0_i32 : i32, i32
  }
}

</mosaic_0001>

<bundles_post_ra>
// kernel: tpu_custom_call.1
= control target key start
LH: loop header
LB: loop body
LE: loop exit
PB: predicated region body
PF: predicated region fallthrough
CT: control target
= control target key end

     0   :  { %13 = vsyncpa [#allocation3], 0  ;;  %s1676_s0 = inlined_call_operand.vmem [shape: f32[2,32,16], index: 0, kind: input, shape index: {}]   ;;  %s1677_s1 = inlined_call_operand.vmem [shape: f32[3,32,96], index: 1, kind: input, shape index: {}]   ;;  %s1678_s2 = inlined_call_operand.hbm [shape: f32[3,1,32], index: 2, kind: input, shape index: {}]   ;;  %s1679_s3 = inlined_call_operand.hbm [shape: f32[32,33], index: 3, kind: input, shape index: {}]   ;;  %s1680_s4 = inlined_call_operand.vmem [shape: f32[1,11], index: 4, kind: input, shape index: {}]   ;;  %s1681_s5 = inlined_call_operand.hbm [shape: f32[8,128], index: 5, kind: input, shape index: {}]   ;;  %s1682_s6 = inlined_call_operand.vmem [shape: f32[3,128], index: 6, kind: input, shape index: {}]   ;;  %s1683_s7 = inlined_call_operand.hbm [shape: f32[1,128], index: 7, kind: input, shape index: {}]   ;;  %s1684_s8 = inlined_call_operand.hbm [shape: f32[32,128], index: 8, kind: output, shape index: {}]  }
   0x1   :  { %14 = vsyncpa [#allocation6], 0 }
   0x2   :  { %15 = vsyncpa [#allocation9], 0  ;;  %s38_s29 = sshll.u32 %s1679_s3, 4  ;;  %s39_s29 = int_to_ptr.hbm [resolvable:$true] %s38_s29 }
   0x3   :  { %16 = vsyncpa [#allocation4], 0  ;;  %s1285_s30 = smov [#allocation5]   ;;  %s25_s12 = sshll.u32 %s1678_s2, 4  ;;  %s26_s12 = int_to_ptr.hbm [resolvable:$true] %s25_s12 }
   0x4   :  { %s40_s9 = sshll.u32 %s1285_s30, 4  ;;  %s1286_s13 = smov 128   ;;  %s41_s9 = int_to_ptr.vmem [resolvable:$true] %s40_s9 }
   0x5   :  { %s1287_s14 = smov 8   ;;  %s1288_s15 = smov [#allocation2]  }
   0x6   :  { %46 = dma.hbm_to_vmem [thread:$0]  %s39_s29, 512, %s41_s9, [#allocation6], %s1286_s13, %s1286_s13, %s1287_s14  }
   0x7   :  { %s27_s16 = sshll.u32 %s1288_s15, 4  ;;  %s1289_s3 = smov 16   ;;  %s28_s16 = int_to_ptr.vmem [resolvable:$true] %s27_s16 }
   0x8   :  { %s1290_s17 = smov 1   ;;  %s54_s20 = sshll.u32 %s1681_s5, 4  ;;  %s55_s20 = int_to_ptr.hbm [resolvable:$true] %s54_s20 }
   0x9   :  { %33 = dma.hbm_to_vmem [thread:$0]  %s26_s12, 48, %s28_s16, [#allocation3], %s1289_s3, %s1289_s3, %s1290_s17  }
   0xa   :  { %s1291_s21 = smov [#allocation7]   ;;  %s67_s24 = sshll.u32 %s1683_s7, 4  ;;  %s68_s24 = int_to_ptr.hbm [resolvable:$true] %s67_s24 }
   0xb   :  { %s56_s2 = sshll.u32 %s1291_s21, 4  ;;  %s1292_s25 = smov [#allocation8]   ;;  %s57_s2 = int_to_ptr.vmem [resolvable:$true] %s56_s2 }
   0xc   :  { %59 = dma.hbm_to_vmem [thread:$0]  %s55_s20, 128, %s57_s2, [#allocation6]  }
   0xd   :  { %s69_s26 = sshll.u32 %s1292_s25, 4  ;;  %s70_s26 = int_to_ptr.vmem [resolvable:$true] %s69_s26 }
   0xe   :  { %72 = dma.hbm_to_vmem [thread:$0]  %s68_s24, 16, %s70_s26, [#allocation9]  }
   0xf   :  { %1277 = dma.done.wait [#allocation3], 48  }
  0x10   :  { %1278 = vsyncadd [#allocation3], 4294967248 }
  0x11   :  { %1279 = dma.done.wait [#allocation6], 640  }
  0x12   :  { %1280 = vsyncadd [#allocation6], 4294966656 }
  0x13   :  { %1281 = dma.done.wait [#allocation9], 16  }
  0x14   :  { %1282 = vsyncadd [#allocation9], 4294967280  ;;  %v1074_v0 = vld [vmem:[%s1676_s0 + $0x20] sm:$0xff]  ;;  %v226_v2 = vld [vmem:[%s1677_s1 + $0x18] sm:$0xff]  ;;  %vm227_vm0 = vcmask 261120   ;;  %s1293_s5 = smov 64   ;;  %v162_v17 = vlaneseq }
  0x15   :  { %v89_v1 = vld [vmem:[%s1676_s0] sm:$0xff]  ;;  %130 = vxpose.xlu1.b32.start [1/4] (short) (narrow) %v1074_v0, 16  ;;  %252 = vmatpush.msra.mxu0 %v226_v2  ;;  %v225_v3 = vld [vmem:[%s1677_s1 + $0x10] sm:$0xff]  ;;  %v224_v4 = vld [vmem:[%s1677_s1 + $0x8] sm:$0xff]  ;;  %s1295_s12 = smov 96   ;;  %s1297_s2 = smov 11  }
  0x16   :  { %93 = vxpose.xlu0.b32.start [1/4] (short) (narrow) %v89_v1, 16  ;;  %1111 = vmatpush.msra.mxu2 %v226_v2  ;;  %v1075_v5 = vld [vmem:[%s1676_s0 + $0x28] sm:$0xff]  ;;  %v223_v7 = vld [vmem:[%s1677_s1] sm:$0xff]  ;;  %v1076_v8 = vld [vmem:[%s1676_s0 + $0x30] sm:$0xff]  ;;  %v1409_v19 = vshrl.u32 %v162_v17, 7  ;;  %vm822_vm7 = vcmask 179352  }
  0x17   :  { %253 = vmatpush.msra.mxu0 %v225_v3  ;;  %v90_v6 = vld [vmem:[%s1676_s0 + $0x8] sm:$0xff]  ;;  %v91_v9 = vld [vmem:[%s1676_s0 + $0x10] sm:$0xff]  ;;  %v1077_v10 = vld [vmem:[%s1676_s0 + $0x38] sm:$0xff]  ;;  %vm863_vm8 = vcmask 23552   ;;  %s1299_s24 = smov 117   ;;  %s1059_s28 = sshll.u32 %s1684_s8, 4  ;;  %s1060_s28 = int_to_ptr.hbm [resolvable:$true] %s1059_s28 }
  0x18   :  { %1112 = vmatpush.msra.mxu2 %v225_v3  ;;  %v92_v11 = vld [vmem:[%s1676_s0 + $0x18] sm:$0xff]  ;;  %v171_v20 = vand.u32 15, %v1409_v19  ;;  %vm273_vm2 = vcmp.lt.s32.totalorder %v1409_v19, 1  ;;  %s1294_s0 = smov 32   ;;  %v1136_v30 = vld [vmem:[#allocation2] ss:$0 sm:$0xff] }
  0x19   :  { %254 = vmatpush.msra.mxu0 %v224_v4  ;;  %v165_v32 = vadd.s32 16, %v1409_v19  ;;  %v164_v40 = vadd.s32 8, %v1409_v19  ;;  %vm310_vm4 = vcmp.lt.s32.totalorder %v1409_v19, 7  ;;  %v166_v53 = vadd.s32 24, %v1409_v19  ;;  %v1085_v1 = vld [vmem:[%s1677_s1 + $0x38] sm:$0xff]  ;;  %v1084_v2 = vld [vmem:[%s1677_s1 + $0x30] sm:$0xff] }
  0x1a   :  { %1113 = vmatpush.msra.mxu2 %v224_v4  ;;  %vm1417_vm1 = vcmp.eq.s32.totalorder %v171_v20, 0  ;;  %418 = vmatpush.msra.mxu1 %v1085_v1 }
  0x1b   :  { %255 = vmatpush.msra.mxu0 %v223_v7  ;;  %v185_v34 = vand.u32 15, %v165_v32  ;;  %v178_v41 = vand.u32 15, %v164_v40  ;;  %v192_v54 = vand.u32 15, %v166_v53  ;;  %1115 = vmatpush.msra.mxu3 %v1085_v1 }
  0x1c   :  { %1114 = vmatpush.msra.mxu2 %v223_v7  ;;  %419 = vmatpush.msra.mxu1 %v1084_v2 }
  0x1d   :  { %131 = vxpose.xlu1.b32.cont [2/4] (short) (narrow) %v1075_v5, 16  ;;  %vm1437_vm3 = vcmp.eq.s32.totalorder %v185_v34, 0  ;;  %vm1448_vm5 = vcmp.eq.s32.totalorder %v178_v41, 15  ;;  %vm1465_vm6 = vcmp.eq.s32.totalorder %v192_v54, 15  ;;  %v1083_v5 = vld [vmem:[%s1677_s1 + $0x28] sm:$0xff]  ;;  %1116 = vmatpush.msra.mxu3 %v1084_v2 }
  0x1e   :  { %94 = vxpose.xlu0.b32.cont [2/4] (short) (narrow) %v90_v6, 16  ;;  %420 = vmatpush.msra.mxu1 %v1083_v5 }
  0x1f   :  { %1117 = vmatpush.msra.mxu3 %v1083_v5 }
  0x25   :  { %132 = vxpose.xlu1.b32.cont [3/4] (short) (narrow) %v1076_v8, 16  ;;  %v1082_v8 = vld [vmem:[%s1677_s1 + $0x20] sm:$0xff] }
  0x26   :  { %95 = vxpose.xlu0.b32.cont [3/4] (short) (narrow) %v91_v9, 16  ;;  %421 = vmatpush.msra.mxu1 %v1082_v8 }
  0x27   :  { %1118 = vmatpush.msra.mxu3 %v1082_v8  ;;  %v1091_v8 = vld [vmem:[%s1677_s1 + $0x48] sm:$0xff] }
  0x2d   :  { %133 = vxpose.xlu1.b32.end [4/4] (short) (narrow) %v1077_v10, 16 }
  0x2e   :  { %96 = vxpose.xlu0.b32.end [4/4] (short) (narrow) %v92_v11, 16 }
  0xb9   :  { %v146_v12 = vpop.trf.xlu1 }
  0xba   :  { %v109_v13 = vpop.trf.xlu0  ;;  %1080 = vmatmul.msk.f32.vlgmr.msra.gmra.mxu2 %vm227_vm0, %v146_v12 }
  0xbb   :  { %1078 = vmatmul.msk.f32.vlgmr.msra.gmra.mxu0 %vm227_vm0, %v109_v13 }
  0xc1   :  { %v147_v14 = vpop.trf.xlu1 }
  0xc2   :  { %v110_v15 = vpop.trf.xlu0  ;;  %1081 = vmatmul.msk.f32.gmra.mxu2 %vm227_vm0, %v147_v14 }
  0xc3   :  { %1079 = vmatmul.msk.f32.gmra.mxu0 %vm227_vm0, %v110_v15 }
 0x138   :  { %v1401_v16 = vpop.f32.mrf.mxu0 }
 0x139   :  { %294 = vrot.lane.b32.xlu2 %v1401_v16, %s1293_s5  ;;  %v269_v22 = vrot.slane %v1401_v16, 7 }
 0x13d   :  { %v1405_v18 = vpop.f32.mrf.mxu2 }
 0x13e   :  { %v271_v23 = vrot.slane %v1405_v18, 7 }
 0x140   :  { %v260_v26 = vpop.f32.mrf.mxu0 }
 0x141   :  { %298 = vrot.lane.b32.xlu2 %v1405_v18, %s1293_s5  ;;  %v270_v31 = vrot.slane %v260_v26, 7 }
 0x143   :  { %v276_v33 = vsel %vm273_vm2, %v269_v22, %v270_v31  ;;  %v275_v36 = vsel %vm273_vm2, %v270_v31, %v271_v23 }
 0x144   :  { %v288_v37 = vsel %vm1437_vm3, 0.0, %v275_v36 }
 0x145   :  { %v1412_v21 = vpop.f32.mrf.mxu2 }
 0x146   :  { %v272_v24 = vrot.slane %v1412_v21, 7 }
 0x148   :  { %v277_v27 = vsel %vm273_vm2, %v272_v24, %v269_v22  ;;  %v274_v28 = vsel %vm273_vm2, %v271_v23, %v272_v24 }
 0x149   :  { %296 = vrot.lane.b32.xlu2 %v260_v26, %s1293_s5  ;;  %v286_v29 = vsel %vm1417_vm1, 0.0, %v277_v27 }
 0x14a   :  { %331 = vrot.lane.b32.xlu0 %v286_v29, %s1294_s0 }
 0x151   :  { %300 = vrot.lane.b32.xlu2 %v1412_v21, %s1293_s5 }
 0x159   :  { %370 = vrot.lane.b32.xlu2 %v1136_v30, %s1294_s0 }
 0x161   :  { %333 = vrot.lane.b32.xlu2 %v276_v33, %s1294_s0 }
 0x169   :  { %335 = vrot.lane.b32.xlu2 %v288_v37, %s1294_s0 }
 0x193   :  { %v295_v38 = vpop.permute.xlu2 %294 }
 0x194   :  { %v306_v43 = vrot.slane %v295_v38, 1 }
 0x19b   :  { %v299_v39 = vpop.permute.xlu2 %298 }
 0x19c   :  { %v308_v44 = vrot.slane %v299_v39, 1 }
 0x1a3   :  { %v297_v42 = vpop.permute.xlu2 %296 }
 0x1a4   :  { %v307_v45 = vrot.slane %v297_v42, 1 }
 0x1a6   :  { %v313_v47 = vsel %vm310_vm4, %v306_v43, %v307_v45  ;;  %v312_v48 = vsel %vm310_vm4, %v307_v45, %v308_v44 }
 0x1a7   :  { %351 = vrot.lane.b32.xlu1 %v313_v47, %s1294_s0  ;;  %v324_v49 = vsel %vm1448_vm5, 0.0, %v312_v48 }
 0x1a8   :  { %353 = vrot.lane.b32.xlu2 %v324_v49, %s1294_s0 }
 0x1ab   :  { %v301_v50 = vpop.permute.xlu2 %300 }
 0x1ac   :  { %v309_v51 = vrot.slane %v301_v50, 1 }
 0x1ae   :  { %v311_v52 = vsel %vm310_vm4, %v308_v44, %v309_v51  ;;  %v314_v56 = vsel %vm310_vm4, %v309_v51, %v306_v43 }
 0x1af   :  { %v326_v57 = vsel %vm1465_vm6, 0.0, %v314_v56 }
 0x1b0   :  { %355 = vrot.lane.b32.xlu2 %v311_v52, %s1294_s0 }
 0x1b3   :  { %v371_v58 = vpop.permute.xlu2 %370 }
 0x1b8   :  { %337 = vrot.lane.b32.xlu2 %v274_v28, %s1294_s0 }
 0x1bb   :  { %v334_v59 = vpop.permute.xlu2 %333 }
 0x1bc   :  { %v332_v62 = vpop.permute.xlu0 %331  ;;  %v344_v6 = vadd.f32 %v334_v59, %v260_v26 }
 0x1bd   :  { %v343_v0 = vadd.f32 %v332_v62, %v1401_v16 }
 0x1c0   :  { %357 = vrot.lane.b32.xlu2 %v326_v57, %s1294_s0 }
 0x1c3   :  { %v336_v60 = vpop.permute.xlu2 %335 }
 0x1c4   :  { %v345_v13 = vadd.f32 %v336_v60, %v1405_v18 }
 0x202   :  { %v354_v61 = vpop.permute.xlu2 %353 }
 0x203   :  { %v364_v9 = vadd.f32 %v354_v61, %v344_v6 }
 0x205   :  { %v374_v12 = vadd.f32 %v371_v58, %v364_v9 }
 0x207   :  { %v378_v14 = vmax.f32 %v374_v12, 0.0 }
 0x20a   :  { %v356_v63 = vpop.permute.xlu2 %355 }
 0x20b   :  { %v365_v15 = vadd.f32 %v356_v63, %v345_v13 }
 0x20d   :  { %v375_v16 = vadd.f32 %v371_v58, %v365_v15 }
 0x20f   :  { %v379_v22 = vmax.f32 %v375_v16, 0.0 }
 0x212   :  { %v338_v11 = vpop.permute.xlu2 %337 }
 0x213   :  { %v346_v20 = vadd.f32 %v338_v11, %v1412_v21  ;;  %v1137_v21 = vld [vmem:[#allocation2 + $0x1] ss:$0 sm:$0xff] }
 0x214   :  { %519 = vrot.lane.b32.xlu0 %v1137_v21, %s1294_s0  ;;  %v1090_v11 = vld [vmem:[%s1677_s1 + $0x40] sm:$0xff] }
 0x219   :  { %v352_v3 = vpop.permute.xlu1 %351 }
 0x21a   :  { %v363_v4 = vadd.f32 %v352_v3, %v343_v0  ;;  %v358_v17 = vpop.permute.xlu2 %357  ;;  %v1093_v3 = vld [vmem:[%s1677_s1 + $0x58] sm:$0xff] }
 0x21b   :  { %v366_v23 = vadd.f32 %v358_v17, %v346_v20  ;;  %567 = vmatpush.msrb.mxu2 %v1093_v3 }
 0x21c   :  { %v373_v7 = vadd.f32 %v371_v58, %v363_v4  ;;  %v1092_v4 = vld [vmem:[%s1677_s1 + $0x50] sm:$0xff]  ;;  %s1296_s1 = smov 106  }
 0x21d   :  { %v376_v24 = vadd.f32 %v371_v58, %v366_v23  ;;  %568 = vmatpush.msrb.mxu2 %v1092_v4 }
 0x21e   :  { %v377_v10 = vmax.f32 %v373_v7, 0.0 }
 0x21f   :  { %v380_v26 = vmax.f32 %v376_v24, 0.0  ;;  %569 = vmatpush.msrb.mxu2 %v1091_v8 }
 0x220   :  { %390 = vrot.lane.b32.xlu2 %v377_v10, %s1295_s12 }
 0x221   :  { %570 = vmatpush.msrb.mxu2 %v1090_v11 }
 0x228   :  { %392 = vrot.lane.b32.xlu2 %v378_v14, %s1295_s12 }
 0x230   :  { %394 = vrot.lane.b32.xlu2 %v379_v22, %s1295_s12 }
 0x238   :  { %396 = vrot.lane.b32.xlu2 %v380_v26, %s1295_s12 }
 0x27a   :  { %v391_v27 = vpop.permute.xlu2 %390 }
 0x27b   :  { %1086 = vmatmul.msk.f32.vlgmr.msra.gmra.mxu1 %vm227_vm0, %v391_v27 }
 0x282   :  { %v393_v18 = vpop.permute.xlu2 %392 }
 0x283   :  { %1087 = vmatmul.msk.f32.gmra.mxu1 %vm227_vm0, %v393_v18 }
 0x286   :  { %v520_v62 = vpop.permute.xlu0 %519 }
 0x28a   :  { %v395_v28 = vpop.permute.xlu2 %394 }
 0x28b   :  { %1088 = vmatmul.msk.f32.vlgmr.msra.gmra.mxu3 %vm227_vm0, %v395_v28 }
 0x292   :  { %v397_v29 = vpop.permute.xlu2 %396 }
 0x293   :  { %1089 = vmatmul.msk.f32.gmra.mxu3 %vm227_vm0, %v397_v29 }
 0x2f8   :  { %v423_v30 = vpop.f32.mrf.mxu1 }
 0x2f9   :  { %451 = vrot.lane.b32.xlu2 %v423_v30, %s1293_s5  ;;  %v435_v39 = vrot.slane %v423_v30, 7 }
 0x300   :  { %v426_v31 = vpop.f32.mrf.mxu1 }
 0x301   :  { %453 = vrot.lane.b32.xlu1 %v426_v31, %s1293_s5  ;;  %v436_v33 = vrot.slane %v426_v31, 7 }
 0x303   :  { %v441_v44 = vsel %vm273_vm2, %v435_v39, %v436_v33 }
 0x30e   :  { %v429_v32 = vpop.f32.mrf.mxu3 }
 0x30f   :  { %v437_v34 = vrot.slane %v429_v32, 7  ;;  %455 = vrot.lane.b32.xlu2 %v429_v32, %s1293_s5 }
 0x311   :  { %v440_v36 = vsel %vm273_vm2, %v436_v33, %v437_v34 }
 0x312   :  { %v445_v37 = vsel %vm1437_vm3, 0.0, %v440_v36 }
 0x313   :  { %483 = vrot.lane.b32.xlu0 %v445_v37, %s1294_s0 }
 0x316   :  { %v432_v38 = vpop.f32.mrf.mxu3 }
 0x317   :  { %v438_v40 = vrot.slane %v432_v38, 7  ;;  %457 = vrot.lane.b32.xlu1 %v432_v38, %s1293_s5 }
 0x319   :  { %v442_v41 = vsel %vm273_vm2, %v438_v40, %v435_v39  ;;  %v439_v42 = vsel %vm273_vm2, %v437_v34, %v438_v40 }
 0x31a   :  { %v443_v43 = vsel %vm1417_vm1, 0.0, %v442_v41 }
 0x31b   :  { %479 = vrot.lane.b32.xlu2 %v443_v43, %s1294_s0  ;;  %v1138_v43 = vld [vmem:[#allocation2 + $0x2] ss:$0 sm:$0xff] }
 0x323   :  { %481 = vrot.lane.b32.xlu2 %v441_v44, %s1294_s0 }
 0x353   :  { %v452_v45 = vpop.permute.xlu2 %451 }
 0x354   :  { %v463_v48 = vrot.slane %v452_v45, 1 }
 0x369   :  { %v456_v50 = vpop.permute.xlu2 %455 }
 0x36a   :  { %v465_v52 = vrot.slane %v456_v50, 1 }
 0x373   :  { %v454_v47 = vpop.permute.xlu1 %453 }
 0x374   :  { %v464_v49 = vrot.slane %v454_v47, 1 }
 0x375   :  { %v480_v61 = vpop.permute.xlu2 %479 }
 0x376   :  { %v469_v51 = vsel %vm310_vm4, %v463_v48, %v464_v49  ;;  %v468_v53 = vsel %vm310_vm4, %v464_v49, %v465_v52  ;;  %v491_v5 = vadd.f32 %v480_v61, %v423_v30 }
 0x377   :  { %499 = vrot.lane.b32.xlu1 %v469_v51, %s1294_s0  ;;  %v472_v54 = vsel %vm1448_vm5, 0.0, %v468_v53 }
 0x37d   :  { %v482_v63 = vpop.permute.xlu2 %481 }
 0x37e   :  { %v492_v15 = vadd.f32 %v482_v63, %v426_v31 }
 0x37f   :  { %501 = vrot.lane.b32.xlu1 %v472_v54, %s1294_s0 }
 0x385   :  { %v484_v0 = vpop.permute.xlu0 %483 }
 0x386   :  { %v493_v1 = vadd.f32 %v484_v0, %v429_v32 }
 0x387   :  { %485 = vrot.lane.b32.xlu1 %v439_v42, %s1294_s0 }
 0x389   :  { %v458_v56 = vpop.permute.xlu1 %457 }
 0x38a   :  { %v466_v57 = vrot.slane %v458_v56, 1 }
 0x38c   :  { %v467_v58 = vsel %vm310_vm4, %v465_v52, %v466_v57  ;;  %v470_v59 = vsel %vm310_vm4, %v466_v57, %v463_v48 }
 0x38d   :  { %503 = vrot.lane.b32.xlu2 %v467_v58, %s1294_s0  ;;  %v474_v60 = vsel %vm1465_vm6, 0.0, %v470_v59 }
 0x38e   :  { %505 = vrot.lane.b32.xlu0 %v474_v60, %s1294_s0 }
 0x3e7   :  { %v504_v2 = vpop.permute.xlu2 %503 }
 0x3e8   :  { %v513_v6 = vadd.f32 %v504_v2, %v493_v1 }
 0x3e9   :  { %v500_v7 = vpop.permute.xlu1 %499 }
 0x3ea   :  { %v524_v9 = vadd.f32 %v520_v62, %v513_v6  ;;  %v511_v10 = vadd.f32 %v500_v7, %v491_v5 }
 0x3ec   :  { %v528_v12 = vmax.f32 %v524_v9, 0.0  ;;  %v522_v13 = vadd.f32 %v520_v62, %v511_v10 }
 0x3ee   :  { %v526_v14 = vmax.f32 %v522_v13, 0.0  ;;  %543 = vrot.lane.b32.xlu0 %v528_v12, %s1295_s12 }
 0x3f0   :  { %539 = vrot.lane.b32.xlu2 %v526_v14, %s1295_s12 }
 0x3f1   :  { %v502_v16 = vpop.permute.xlu1 %501 }
 0x3f2   :  { %v512_v17 = vadd.f32 %v502_v16, %v492_v15 }
 0x3f4   :  { %v523_v20 = vadd.f32 %v520_v62, %v512_v17 }
 0x3f6   :  { %v527_v22 = vmax.f32 %v523_v20, 0.0 }
 0x3f8   :  { %541 = vrot.lane.b32.xlu1 %v527_v22, %s1295_s12 }
 0x3f9   :  { %v486_v23 = vpop.permute.xlu1 %485 }
 0x3fa   :  { %v494_v24 = vadd.f32 %v486_v23, %v432_v38 }
 0x400   :  { %v506_v26 = vpop.permute.xlu0 %505 }
 0x401   :  { %v514_v27 = vadd.f32 %v506_v26, %v494_v24 }
 0x403   :  { %v525_v18 = vadd.f32 %v520_v62, %v514_v27 }
 0x405   :  { %v529_v28 = vmax.f32 %v525_v18, 0.0 }
 0x407   :  { %545 = vrot.lane.b32.xlu2 %v529_v28, %s1295_s12  ;;  %v682_v28 = vld [vmem:[#allocation5 + $0x18] sm:$0xff] }
 0x408   :  { %715 = vmatpush.msrb.mxu3 %v682_v28 }
 0x44a   :  { %v540_v29 = vpop.permute.xlu2 %539 }
 0x44b   :  { %1094 = vmatmul.msk.f32.vlgmr.msrb.gmra.mxu2 %vm227_vm0, %v540_v29  ;;  %v681_v29 = vld [vmem:[#allocation5 + $0x10] sm:$0xff] }
 0x44c   :  { %716 = vmatpush.msrb.mxu3 %v681_v29 }
 0x460   :  { %v544_v30 = vpop.permute.xlu0 %543 }
 0x461   :  { %v546_v31 = vpop.permute.xlu2 %545 }
 0x46a   :  { %v542_v21 = vpop.permute.xlu1 %541 }
 0x46b   :  { %1095 = vmatmul.msk.f32.gmra.mxu2 %vm227_vm0, %v542_v21  ;;  %v680_v21 = vld [vmem:[#allocation5 + $0x8] sm:$0xff] }
 0x46c   :  { %717 = vmatpush.msrb.mxu3 %v680_v21 }
 0x473   :  { %1096 = vmatmul.msk.f32.gmra.mxu2 %vm227_vm0, %v544_v30  ;;  %v679_v30 = vld [vmem:[#allocation5] sm:$0xff] }
 0x474   :  { %718 = vmatpush.msrb.mxu3 %v679_v30 }
 0x47b   :  { %1097 = vmatmul.msk.f32.gmra.mxu2 %vm227_vm0, %v546_v31 }
 0x4ce   :  { %v572_v32 = vpop.f32.mrf.mxu2 }
 0x4cf   :  { %600 = vrot.lane.b32.xlu1 %v572_v32, %s1293_s5  ;;  %v584_v37 = vrot.slane %v572_v32, 7 }
 0x4ee   :  { %v575_v33 = vpop.f32.mrf.mxu2 }
 0x4ef   :  { %602 = vrot.lane.b32.xlu0 %v575_v33, %s1293_s5  ;;  %v585_v44 = vrot.slane %v575_v33, 7 }
 0x4f1   :  { %v590_v45 = vsel %vm273_vm2, %v584_v37, %v585_v44 }
 0x4f6   :  { %v578_v34 = vpop.f32.mrf.mxu2 }
 0x4f7   :  { %604 = vrot.lane.b32.xlu2 %v578_v34, %s1293_s5  ;;  %v586_v38 = vrot.slane %v578_v34, 7 }
 0x4f9   :  { %v589_v47 = vsel %vm273_vm2, %v585_v44, %v586_v38 }
 0x4fa   :  { %v594_v48 = vsel %vm1437_vm3, 0.0, %v589_v47  ;;  %v1139_v47 = vld [vmem:[%s1680_s4] ss:$0 sm:$0xff]  ;;  %s1298_s4 = smov 109  }
 0x4fe   :  { %v581_v36 = vpop.f32.mrf.mxu2 }
 0x4ff   :  { %v587_v39 = vrot.slane %v581_v36, 7  ;;  %606 = vrot.lane.b32.xlu1 %v581_v36, %s1293_s5 }
 0x501   :  { %v591_v40 = vsel %vm273_vm2, %v587_v39, %v584_v37  ;;  %v588_v41 = vsel %vm273_vm2, %v586_v38, %v587_v39 }
 0x502   :  { %v592_v42 = vsel %vm1417_vm1, 0.0, %v591_v40 }
 0x503   :  { %628 = vrot.lane.b32.xlu0 %v592_v42, %s1294_s0 }
 0x507   :  { %668 = vrot.lane.b32.xlu1 %v1138_v43, %s1294_s0 }
 0x50b   :  { %630 = vrot.lane.b32.xlu0 %v590_v45, %s1294_s0 }
 0x50f   :  { %632 = vrot.lane.b32.xlu1 %v594_v48, %s1294_s0 }
 0x541   :  { %v601_v49 = vpop.permute.xlu1 %600 }
 0x542   :  { %v612_v51 = vrot.slane %v601_v49, 1 }
 0x551   :  { %v605_v53 = vpop.permute.xlu2 %604 }
 0x552   :  { %v614_v56 = vrot.slane %v605_v53, 1 }
 0x561   :  { %v603_v50 = vpop.permute.xlu0 %602 }
 0x562   :  { %v613_v52 = vrot.slane %v603_v50, 1 }
 0x564   :  { %v618_v54 = vsel %vm310_vm4, %v612_v51, %v613_v52  ;;  %v617_v57 = vsel %vm310_vm4, %v613_v52, %v614_v56 }
 0x565   :  { %648 = vrot.lane.b32.xlu2 %v618_v54, %s1294_s0  ;;  %v621_v58 = vsel %vm1448_vm5, 0.0, %v617_v57 }
 0x56d   :  { %650 = vrot.lane.b32.xlu2 %v621_v58, %s1294_s0 }
 0x571   :  { %v607_v59 = vpop.permute.xlu1 %606 }
 0x572   :  { %v615_v60 = vrot.slane %v607_v59, 1 }
 0x574   :  { %v616_v61 = vsel %vm310_vm4, %v614_v56, %v615_v60  ;;  %v619_v62 = vsel %vm310_vm4, %v615_v60, %v612_v51 }
 0x575   :  { %652 = vrot.lane.b32.xlu0 %v616_v61, %s1294_s0  ;;  %634 = vrot.lane.b32.xlu2 %v588_v41, %s1294_s0  ;;  %v623_v63 = vsel %vm1465_vm6, 0.0, %v619_v62  ;;  %v629_v0 = vpop.permute.xlu0 %628 }
 0x576   :  { %654 = vrot.lane.b32.xlu1 %v623_v63, %s1294_s0  ;;  %v640_v1 = vadd.f32 %v629_v0, %v572_v32 }
 0x579   :  { %v669_v4 = vpop.permute.xlu1 %668 }
 0x57d   :  { %v631_v6 = vpop.permute.xlu0 %630 }
 0x57e   :  { %v641_v8 = vadd.f32 %v631_v6, %v575_v33 }
 0x581   :  { %v633_v13 = vpop.permute.xlu1 %632 }
 0x582   :  { %v642_v15 = vadd.f32 %v633_v13, %v578_v34 }
 0x5bf   :  { %v649_v2 = vpop.permute.xlu2 %648 }
 0x5c0   :  { %v660_v3 = vadd.f32 %v649_v2, %v640_v1 }
 0x5c2   :  { %v671_v5 = vadd.f32 %v669_v4, %v660_v3 }
 0x5c4   :  { %v675_v7 = vmax.f32 %v671_v5, 0.0 }
 0x5c6   :  { %687 = vrot.lane.b32.xlu0 %v675_v7, %s1295_s12 }
 0x5c7   :  { %v651_v9 = vpop.permute.xlu2 %650 }
 0x5c8   :  { %v661_v10 = vadd.f32 %v651_v9, %v641_v8 }
 0x5ca   :  { %v672_v11 = vadd.f32 %v669_v4, %v661_v10 }
 0x5cc   :  { %v676_v12 = vmax.f32 %v672_v11, 0.0 }
 0x5ce   :  { %689 = vrot.lane.b32.xlu2 %v676_v12, %s1295_s12 }
 0x5cf   :  { %v635_v14 = vpop.permute.xlu2 %634 }
 0x5d0   :  { %v643_v16 = vadd.f32 %v635_v14, %v581_v36 }
 0x5e7   :  { %v653_v17 = vpop.permute.xlu0 %652 }
 0x5e8   :  { %v662_v20 = vadd.f32 %v653_v17, %v642_v15  ;;  %v655_v22 = vpop.permute.xlu1 %654 }
 0x5e9   :  { %v663_v23 = vadd.f32 %v655_v22, %v643_v16 }
 0x5ea   :  { %v673_v24 = vadd.f32 %v669_v4, %v662_v20 }
 0x5eb   :  { %v674_v26 = vadd.f32 %v669_v4, %v663_v23 }
 0x5ec   :  { %v677_v27 = vmax.f32 %v673_v24, 0.0 }
 0x5ed   :  { %v678_v18 = vmax.f32 %v674_v26, 0.0 }
 0x5ee   :  { %691 = vrot.lane.b32.xlu1 %v677_v27, %s1295_s12 }
 0x5ef   :  { %693 = vrot.lane.b32.xlu0 %v678_v18, %s1295_s12 }
 0x628   :  { %v690_v32 = vpop.permute.xlu2 %689 }
 0x638   :  { %v688_v31 = vpop.permute.xlu0 %687 }
 0x639   :  { %1098 = vmatmul.msk.f32.vlgmr.msrb.gmra.mxu3 %vm227_vm0, %v688_v31 }
 0x641   :  { %1099 = vmatmul.msk.f32.gmra.mxu3 %vm227_vm0, %v690_v32 }
 0x660   :  { %v692_v33 = vpop.permute.xlu1 %691 }
 0x661   :  { %1100 = vmatmul.msk.f32.gmra.mxu3 %vm227_vm0, %v692_v33  ;;  %v694_v34 = vpop.permute.xlu0 %693 }
 0x669   :  { %1101 = vmatmul.msk.f32.gmra.mxu3 %vm227_vm0, %v694_v34 }
 0x6bc   :  { %v720_v36 = vpop.f32.mrf.mxu3 }
 0x6bd   :  { %748 = vrot.lane.b32.xlu2 %v720_v36, %s1296_s1  ;;  %v732_v40 = vrot.slane %v720_v36, 7 }
 0x6c4   :  { %v723_v37 = vpop.f32.mrf.mxu3 }
 0x6c5   :  { %750 = vrot.lane.b32.xlu1 %v723_v37, %s1296_s1  ;;  %v733_v48 = vrot.slane %v723_v37, 7 }
 0x6c7   :  { %v738_v49 = vsel %vm273_vm2, %v732_v40, %v733_v48 }
 0x6e4   :  { %v726_v38 = vpop.f32.mrf.mxu3 }
 0x6e5   :  { %752 = vrot.lane.b32.xlu0 %v726_v38, %s1296_s1  ;;  %v734_v41 = vrot.slane %v726_v38, 7 }
 0x6e7   :  { %v737_v50 = vsel %vm273_vm2, %v733_v48, %v734_v41 }
 0x6e8   :  { %v742_v51 = vsel %vm1437_vm3, 0.0, %v737_v50 }
 0x6ec   :  { %v729_v39 = vpop.f32.mrf.mxu3 }
 0x6ed   :  { %v735_v42 = vrot.slane %v729_v39, 7  ;;  %754 = vrot.lane.b32.xlu2 %v729_v39, %s1296_s1 }
 0x6ef   :  { %v739_v43 = vsel %vm273_vm2, %v735_v42, %v732_v40  ;;  %v736_v44 = vsel %vm273_vm2, %v734_v41, %v735_v42  ;;  %vm1012_vm2 = vcmask 1042432  }
 0x6f0   :  { %v740_v45 = vsel %vm1417_vm1, 0.0, %v739_v43  ;;  %vm953_vm1 = vcmask 64512  }
 0x6f1   :  { %776 = vrot.lane.b32.xlu1 %v740_v45, %s1297_s2 }
 0x6f5   :  { %815 = vrot.lane.b32.xlu2 %v1139_v47, %s1297_s2 }
 0x6f9   :  { %778 = vrot.lane.b32.xlu1 %v738_v49, %s1297_s2 }
 0x6fd   :  { %780 = vrot.lane.b32.xlu2 %v742_v51, %s1297_s2  ;;  %v936_v51 = vld [vmem:[#allocation7] sm:$0xff] }
 0x6fe   :  { %977 = vmatpush.msrb.mxu0 %v936_v51 }
 0x717   :  { %v749_v25 = vpop.permute.xlu2 %748 }
 0x718   :  { %v760_v53 = vrot.slane %v749_v25, 1 }
 0x737   :  { %v751_v52 = vpop.permute.xlu1 %750 }
 0x738   :  { %v761_v54 = vrot.slane %v751_v52, 1 }
 0x73a   :  { %v766_v56 = vsel %vm310_vm4, %v760_v53, %v761_v54 }
 0x73b   :  { %796 = vrot.lane.b32.xlu0 %v766_v56, %s1297_s2 }
 0x747   :  { %v755_v57 = vpop.permute.xlu2 %754 }
 0x748   :  { %v763_v58 = vrot.slane %v755_v57, 1 }
 0x74a   :  { %v767_v59 = vsel %vm310_vm4, %v763_v58, %v760_v53 }
 0x74b   :  { %v771_v60 = vsel %vm1465_vm6, 0.0, %v767_v59 }
 0x74c   :  { %802 = vrot.lane.b32.xlu2 %v771_v60, %s1297_s2 }
 0x74f   :  { %v816_v4 = vpop.permute.xlu2 %815 }
 0x757   :  { %v753_v35 = vpop.permute.xlu0 %752  ;;  %v781_v8 = vpop.permute.xlu2 %780 }
 0x758   :  { %v762_v61 = vrot.slane %v753_v35, 1  ;;  %v790_v19 = vadd.f32 %v781_v8, %v726_v38 }
 0x75a   :  { %v764_v62 = vsel %vm310_vm4, %v762_v61, %v763_v58  ;;  %v765_v63 = vsel %vm310_vm4, %v761_v54, %v762_v61 }
 0x75b   :  { %800 = vrot.lane.b32.xlu1 %v764_v62, %s1297_s2  ;;  %v769_v0 = vsel %vm1448_vm5, 0.0, %v765_v63 }
 0x75c   :  { %798 = vrot.lane.b32.xlu0 %v769_v0, %s1297_s2 }
 0x763   :  { %v777_v1 = vpop.permute.xlu1 %776 }
 0x764   :  { %782 = vrot.lane.b32.xlu0 %v736_v44, %s1297_s2  ;;  %v788_v2 = vadd.f32 %v777_v1, %v720_v36 }
 0x76b   :  { %v779_v7 = vpop.permute.xlu1 %778 }
 0x76c   :  { %v789_v9 = vadd.f32 %v779_v7, %v723_v37 }
 0x7a6   :  { %v803_v22 = vpop.permute.xlu2 %802 }
 0x7ad   :  { %v797_v3 = vpop.permute.xlu0 %796 }
 0x7ae   :  { %v808_v55 = vadd.f32 %v797_v3, %v788_v2 }
 0x7b0   :  { %v818_v5 = vadd.f32 %v816_v4, %v808_v55 }
 0x7b2   :  { %v823_v6 = vsel %vm822_vm7, %v818_v5, -inf }
 0x7b3   :  { %824 = vmax.xlane.f32.xlu1 %v823_v6 }
 0x7cd   :  { %v801_v10 = vpop.permute.xlu1 %800 }
 0x7ce   :  { %v810_v11 = vadd.f32 %v801_v10, %v790_v19  ;;  %v799_v46 = vpop.permute.xlu0 %798  ;;  %v991_v10 = vld [vmem:[%s1682_s6] sm:$0x7]  ;;  %s1300_s6 = smov [#allocation10]  }
 0x7cf   :  { %v809_v12 = vadd.f32 %v799_v46, %v789_v9  ;;  %1106 = vmatpush.msk.msrb.mxu1 %vm1012_vm2, %v991_v10  ;;  %s1057_s5 = sshll.u32 %s1300_s6, 4  ;;  %s1058_s5 = int_to_ptr.vmem [resolvable:$true] %s1057_s5 }
 0x7d0   :  { %v1627_v13 = vadd.f32 %v816_v4, %v810_v11 }
 0x7d1   :  { %v819_v14 = vadd.f32 %v816_v4, %v809_v12 }
 0x7d2   :  { %v829_v15 = vsel %vm822_vm7, %v1627_v13, -inf }
 0x7d3   :  { %830 = vmax.xlane.f32.xlu2 %v829_v15  ;;  %v826_v16 = vsel %vm822_vm7, %v819_v14, -inf }
 0x7d4   :  { %827 = vmax.xlane.f32.xlu0 %v826_v16 }
 0x7d6   :  { %v783_v17 = vpop.permute.xlu0 %782 }
 0x7d7   :  { %v791_v20 = vadd.f32 %v783_v17, %v729_v39 }
 0x7d9   :  { %v811_v23 = vadd.f32 %v803_v22, %v791_v20 }
 0x7db   :  { %v821_v24 = vadd.f32 %v816_v4, %v811_v23 }
 0x7dd   :  { %v832_v26 = vsel %vm822_vm7, %v821_v24, -inf }
 0x7de   :  { %833 = vmax.xlane.f32.xlu1 %v832_v26 }
 0x826   :  { %v825_v27 = vpop.xlane.xlu1 %824 }
 0x827   :  { %v835_v18 = vsub.f32 %v818_v5, %v825_v27 }
 0x829   :  { %v839_v28 = vmul.f32 1.442695, %v835_v18 }
 0x82b   :  { %1141 = vpow2.f32 %v839_v28 }
 0x831   :  { %v1142_v29 = vpop.eup %1141 }
 0x832   :  { %851 = vrot.lane.b32.xlu0 %v1142_v29, %s1298_s4 }
 0x846   :  { %v831_v21 = vpop.xlane.xlu2 %830 }
 0x847   :  { %v837_v30 = vsub.f32 %v1627_v13, %v831_v21  ;;  %v828_v31 = vpop.xlane.xlu0 %827 }
 0x848   :  { %v836_v32 = vsub.f32 %v819_v14, %v828_v31 }
 0x849   :  { %v843_v33 = vmul.f32 1.442695, %v837_v30 }
 0x84a   :  { %v841_v34 = vmul.f32 1.442695, %v836_v32 }
 0x84b   :  { %1143 = vpow2.f32 %v843_v33 }
 0x84c   :  { %1145 = vpow2.f32 %v841_v34 }
 0x851   :  { %v1635_v36 = vpop.eup %1143  ;;  %v834_v37 = vpop.xlane.xlu1 %833 }
 0x852   :  { %v1146_v38 = vpop.eup %1145  ;;  %v838_v39 = vsub.f32 %v821_v24, %v834_v37  ;;  %855 = vrot.lane.b32.xlu1 %v1635_v36, %s1298_s4 }
 0x853   :  { %853 = vrot.lane.b32.xlu2 %v1146_v38, %s1298_s4 }
 0x854   :  { %v845_v40 = vmul.f32 1.442695, %v838_v39 }
 0x856   :  { %1147 = vpow2.f32 %v845_v40 }
 0x85c   :  { %v1640_v41 = vpop.eup %1147 }
 0x85d   :  { %857 = vrot.lane.b32.xlu0 %v1640_v41, %s1298_s4 }
 0x8a4   :  { %v852_v42 = vpop.permute.xlu0 %851 }
 0x8a5   :  { %v864_v43 = vsel %vm863_vm8, %v852_v42, 0.0 }
 0x8a6   :  { %865 = vadd.xlane.f32.xlu2 %v864_v43 }
 0x8ad   :  { %v854_v44 = vpop.permute.xlu2 %853 }
 0x8ae   :  { %v867_v45 = vsel %vm863_vm8, %v854_v44, 0.0 }
 0x8af   :  { %868 = vadd.xlane.f32.xlu0 %v867_v45 }
 0x8c3   :  { %945 = vrot.lane.b32.xlu0 %v818_v5, %s1299_s24 }
 0x8c4   :  { %v856_v47 = vpop.permute.xlu1 %855 }
 0x8c5   :  { %v870_v48 = vsel %vm863_vm8, %v856_v47, 0.0 }
 0x8c6   :  { %871 = vadd.xlane.f32.xlu1 %v870_v48 }
 0x8cf   :  { %v858_v49 = vpop.permute.xlu0 %857 }
 0x8d0   :  { %v873_v50 = vsel %vm863_vm8, %v858_v49, 0.0 }
 0x8d1   :  { %874 = vadd.xlane.f32.xlu2 %v873_v50 }
 0x8e9   :  { %947 = vrot.lane.b32.xlu2 %v819_v14, %s1299_s24 }
 0x8f1   :  { %951 = vrot.lane.b32.xlu2 %v821_v24, %s1299_s24 }
 0x919   :  { %v866_v25 = vpop.xlane.xlu2 %865 }
 0x91a   :  { %1149 = vrcp.f32 %v866_v25  ;;  %v887_v57 = vand.u32 2147483648, %v866_v25  ;;  %v885_v59 = vand.u32 2147483647, %v866_v25  ;;  %vm881_vm10 = vweird.f32 %v866_v25 }
 0x91c   :  { %v888_v35 = vor.u32 1.1754944e-38, %v887_v57  ;;  %vm886_vm12 = vcmp.eq.f32.partialorder %v885_v59, 8.507059e+37 }
 0x920   :  { %v1150_v52 = vpop.eup %1149 }
 0x921   :  { %v877_v53 = vmul.f32 %v1150_v52, %v866_v25  ;;  %vm882_vm9 = vweird.f32 %v1150_v52 }
 0x922   :  { %v869_v54 = vpop.xlane.xlu0 %868  ;;  %vm883_vm11 = vmor %vm881_vm10, %vm882_vm9 }
 0x923   :  { %v878_v56 = vsub.f32 1.0, %v877_v53  ;;  %1151 = vrcp.f32 %v869_v54  ;;  %v902_v3 = vand.u32 2147483648, %v869_v54  ;;  %v900_v4 = vand.u32 2147483647, %v869_v54 }
 0x924   :  { %vm896_vm14 = vweird.f32 %v869_v54 }
 0x925   :  { %v879_v58 = vmul.f32 %v1150_v52, %v878_v56  ;;  %v903_v6 = vor.u32 1.1754944e-38, %v902_v3  ;;  %vm901_vm0 = vcmp.eq.f32.partialorder %v900_v4, 8.507059e+37 }
 0x927   :  { %v880_v60 = vadd.f32 %v1150_v52, %v879_v58 }
 0x929   :  { %v1152_v61 = vpop.eup %1151  ;;  %v884_v62 = vsel %vm883_vm11, %v1150_v52, %v880_v60 }
 0x92a   :  { %v892_v63 = vmul.f32 %v1152_v61, %v869_v54  ;;  %v889_v0 = vsel %vm886_vm12, %v888_v35, %v884_v62  ;;  %vm897_vm13 = vweird.f32 %v1152_v61 }
 0x92b   :  { %v890_v1 = vmul.f32 %v1142_v29, %v889_v0  ;;  %vm898_vm15 = vmor %vm896_vm14, %vm897_vm13 }
 0x92c   :  { %v893_v2 = vsub.f32 1.0, %v892_v63 }
 0x92d   :  { %996 = vrot.lane.b32.xlu1 %v890_v1, %s1298_s4 }
 0x92e   :  { %v894_v55 = vmul.f32 %v1152_v61, %v893_v2 }
 0x930   :  { %v895_v5 = vadd.f32 %v1152_v61, %v894_v55 }
 0x932   :  { %v899_v7 = vsel %vm898_vm15, %v1152_v61, %v895_v5 }
 0x933   :  { %v904_v8 = vsel %vm901_vm0, %v903_v6, %v899_v7 }
 0x934   :  { %v905_v19 = vmul.f32 %v1146_v38, %v904_v8 }
 0x935   :  { %949 = vrot.lane.b32.xlu1 %v1627_v13, %s1299_s24  ;;  %v946_v9 = vpop.permute.xlu0 %945 }
 0x936   :  { %998 = vrot.lane.b32.xlu0 %v905_v19, %s1298_s4  ;;  %1102 = vmatmul.msk.f32.vlgmr.msrb.gmra.mxu0 %vm953_vm1, %v946_v9 }
 0x939   :  { %v872_v11 = vpop.xlane.xlu1 %871 }
 0x93a   :  { %1153 = vrcp.f32 %v872_v11  ;;  %v917_v15 = vand.u32 2147483648, %v872_v11  ;;  %v915_v13 = vand.u32 2147483647, %v872_v11  ;;  %vm911_vm4 = vweird.f32 %v872_v11 }
 0x93c   :  { %v918_v22 = vor.u32 1.1754944e-38, %v917_v15  ;;  %vm916_vm6 = vcmp.eq.f32.partialorder %v915_v13, 8.507059e+37 }
 0x940   :  { %v1154_v46 = vpop.eup %1153 }
 0x941   :  { %v907_v12 = vmul.f32 %v1154_v46, %v872_v11  ;;  %vm912_vm3 = vweird.f32 %v1154_v46 }
 0x942   :  { %vm913_vm5 = vmor %vm911_vm4, %vm912_vm3 }
 0x943   :  { %v908_v14 = vsub.f32 1.0, %v907_v12 }
 0x944   :  { %v875_v16 = vpop.xlane.xlu2 %874 }
 0x945   :  { %v909_v17 = vmul.f32 %v1154_v46, %v908_v14  ;;  %1155 = vrcp.f32 %v875_v16  ;;  %v932_v21 = vand.u32 2147483648, %v875_v16  ;;  %v930_v31 = vand.u32 2147483647, %v875_v16 }
 0x946   :  { %vm926_vm9 = vweird.f32 %v875_v16 }
 0x947   :  { %v910_v20 = vadd.f32 %v1154_v46, %v909_v17  ;;  %v933_v33 = vor.u32 1.1754944e-38, %v932_v21  ;;  %vm931_vm11 = vcmp.eq.f32.partialorder %v930_v31, 8.507059e+37 }
 0x949   :  { %v914_v23 = vsel %vm913_vm5, %v1154_v46, %v910_v20 }
 0x94a   :  { %v919_v24 = vsel %vm916_vm6, %v918_v22, %v914_v23 }
 0x94b   :  { %v1156_v26 = vpop.eup %1155  ;;  %v920_v27 = vmul.f32 %v1635_v36, %v919_v24 }
 0x94c   :  { %v922_v18 = vmul.f32 %v1156_v26, %v875_v16  ;;  %v948_v28 = vpop.permute.xlu2 %947  ;;  %vm927_vm7 = vweird.f32 %v1156_v26 }
 0x94d   :  { %1000 = vrot.lane.b32.xlu0 %v920_v27, %s1298_s4  ;;  %1103 = vmatmul.msk.f32.gmra.mxu0 %vm953_vm1, %v948_v28  ;;  %vm928_vm10 = vmor %vm926_vm9, %vm927_vm7 }
 0x94e   :  { %v923_v29 = vsub.f32 1.0, %v922_v18 }
 0x950   :  { %v924_v30 = vmul.f32 %v1156_v26, %v923_v29 }
 0x952   :  { %v925_v32 = vadd.f32 %v1156_v26, %v924_v30 }
 0x954   :  { %v929_v34 = vsel %vm928_vm10, %v1156_v26, %v925_v32  ;;  %v952_v42 = vpop.permute.xlu2 %951 }
 0x955   :  { %v934_v37 = vsel %vm931_vm11, %v933_v33, %v929_v34 }
 0x956   :  { %v935_v36 = vmul.f32 %v1640_v41, %v934_v37  ;;  %v1140_v41 = vld [vmem:[#allocation8] ss:$0 sm:$0xff] }
 0x958   :  { %1002 = vrot.lane.b32.xlu1 %v935_v36, %s1298_s4 }
 0x99f   :  { %v997_v38 = vpop.permute.xlu1 %996 }
 0x9a0   :  { %1107 = vmatmul.msk.f32.vlgmr.msrb.gmra.mxu1 %vm863_vm8, %v997_v38 }
 0x9a7   :  { %v950_v39 = vpop.permute.xlu1 %949 }
 0x9a8   :  { %1104 = vmatmul.msk.f32.gmra.mxu0 %vm953_vm1, %v950_v39  ;;  %v999_v40 = vpop.permute.xlu0 %998 }
 0x9a9   :  { %1108 = vmatmul.msk.f32.gmra.mxu1 %vm863_vm8, %v999_v40 }
 0x9b0   :  { %1105 = vmatmul.msk.f32.gmra.mxu0 %vm953_vm1, %v952_v42 }
 0x9b3   :  { %v979_v45 = vpop.f32.mrf.mxu0 }
 0x9b4   :  { %v980_v47 = vadd.f32 %v1140_v41, %v979_v45 }
 0x9bf   :  { %v1001_v43 = vpop.permute.xlu0 %1000 }
 0x9c0   :  { %1109 = vmatmul.msk.f32.gmra.mxu1 %vm863_vm8, %v1001_v43 }
 0x9ca   :  { %v1003_v44 = vpop.permute.xlu1 %1002  ;;  %v982_v50 = vpop.f32.mrf.mxu0 }
 0x9cb   :  { %1110 = vmatmul.msk.f32.gmra.mxu1 %vm863_vm8, %v1003_v44  ;;  %v983_v51 = vadd.f32 %v1140_v41, %v982_v50 }
 0xa1d   :  { %v1033_v48 = vpop.f32.mrf.mxu1 }
 0xa1e   :  { %v1045_v49 = vmul.f32 %v1033_v48, %v980_v47 }
 0xa20   :  { %1049 = vst [vmem:[#allocation10] sm:$0xff] %v1045_v49 }
 0xa25   :  { %v985_v53 = vpop.f32.mrf.mxu0 }
 0xa26   :  { %v1036_v25 = vpop.f32.mrf.mxu1  ;;  %v986_v54 = vadd.f32 %v1140_v41, %v985_v53 }
 0xa27   :  { %v1046_v52 = vmul.f32 %v1036_v25, %v983_v51 }
 0xa29   :  { %1050 = vst [vmem:[#allocation10 + $0x8] sm:$0xff] %v1046_v52 }
 0xa2d   :  { %v988_v58 = vpop.f32.mrf.mxu0 }
 0xa2e   :  { %v989_v59 = vadd.f32 %v1140_v41, %v988_v58 }
 0xa3d   :  { %v1039_v56 = vpop.f32.mrf.mxu1 }
 0xa3e   :  { %v1047_v57 = vmul.f32 %v1039_v56, %v986_v54 }
 0xa40   :  { %1051 = vst [vmem:[#allocation10 + $0x10] sm:$0xff] %v1047_v57 }
 0xa48   :  { %v1042_v60 = vpop.f32.mrf.mxu1 }
 0xa49   :  { %v1048_v35 = vmul.f32 %v1042_v60, %v989_v59 }
 0xa4b   :  { %1052 = vst [vmem:[#allocation10 + $0x18] sm:$0xff] %v1048_v35 }
 0xa4c   :  { %1065 = dma.vmem_to_hbm [thread:$0]  %s1058_s5, 512, %s1060_s28, [#allocation4], %s1286_s13, %s1286_s13, %s1287_s14  }
 0xa4d   :  { %1283 = dma.done.wait [#allocation4], 512  }
 0xa4e   :  { %1284 = vsyncadd [#allocation4], 4294966784 }
 0xa4f   :  { %1070 = vsyncpa [#allocation3], 1 }
 0xa50   :  { %1071 = vsyncpa [#allocation6], 1 }
 0xa51   :  { %1072 = vsyncpa [#allocation9], 1 }
 0xa52   :  { %1073 = vsyncpa [#allocation4], 1 }

</bundles_post_ra>
